<compile_context>
chip_gen: v5e
topology: v5e:2x2
jax: 0.10.0
libtpu: 0.0.40
codegen_flags: <defaults>
</compile_context>

<pallas_src>
import functools

import jax
import jax.numpy as jnp
from jax.experimental import pallas as pl
from jax.experimental.pallas import tpu as pltpu


def _kv_gather_kernel_none(idx_ref, kv_ref, out_ref, *, p2, topk, rows):
    # idx_ref: (n*p2*topk,) int32 routing indices in SMEM (scalar-prefetched)
    # kv_ref:  (p2, dc_pad) VMEM slab for batch b (fetched once per batch element)
    # out_ref: (rows, dc_pad) VMEM output block, rows = P_BLK*topk
    b = pl.program_id(0)
    pb = pl.program_id(1)
    base = b * (p2 * topk) + pb * rows
    for r in range(rows):  # small static trip count -> fully unrolled
        src = idx_ref[base + r]
        out_ref[pl.ds(r, 1), :] = kv_ref[pl.ds(src, 1), :]


def _kv_gather_kernel_soft(idx_ref, kv_ref, w_ref, out_ref, *, p2, topk, rows):
    # Same local VMEM gather, then one full-block, full-lane multiply by the routing
    # weights.  The multiply accumulates in f32 before casting back to the output
    # dtype (the reference promotes f32 weight x kv before any cast).
    b = pl.program_id(0)
    pb = pl.program_id(1)
    base = b * (p2 * topk) + pb * rows
    for r in range(rows):
        src = idx_ref[base + r]
        out_ref[pl.ds(r, 1), :] = kv_ref[pl.ds(src, 1), :]
    scaled = out_ref[...].astype(jnp.float32) * w_ref[...]  # (rows,1) bcast over lanes
    out_ref[...] = scaled.astype(out_ref.dtype)


def _choose_p_blk(p2, topk, dc_pad, itemsize, *, max_rows=128, out_budget_bytes=4 << 20):
    """Largest divisor of p2 whose fused output block fits the budget, preferring
    sublane-dense blocks (P_BLK*topk multiple of 8)."""
    fallback = None
    for cand in range(p2, 0, -1):
        if p2 % cand:
            continue
        rows = cand * topk
        if rows > max_rows:
            continue
        if 2 * rows * dc_pad * itemsize > out_budget_bytes:
            continue
        if rows % 8 == 0 or cand == p2:
            return cand
        if fallback is None:
            fallback = cand
    return fallback if fallback is not None else 1


def kv_gather(r_idx, r_weight, kv, mul_weight="none"):
    """Pallas equivalent of KVGather.forward.

    r_idx:    (n, p2, topk) integer routing indices
    r_weight: (n, p2, topk) float routing weights (unused for 'none')
    kv:       (n, p2, w2, c_kv)
    returns:  (n, p2, topk, w2, c_kv)
    """
    assert mul_weight in ("none", "soft", "hard")
    if mul_weight == "hard":
        # TODO(synk): 'hard' routing is NotImplementedError in the reference module too.
        raise NotImplementedError("differentiable hard routing TBA")

    n, p2, w2, c_kv = kv.shape
    topk = r_idx.shape[-1]
    assert r_idx.shape == (n, p2, topk)
    dc = w2 * c_kv
    itemsize = jnp.dtype(kv.dtype).itemsize

    # Lane-dense layout: merge (w2, c_kv) -> dc and pad to a multiple of 128 lanes so
    # every store and writeback DMA stays unmasked.
    dc_pad = ((dc + 127) // 128) * 128
    kv2 = kv.reshape(n, p2, dc)
    if dc_pad != dc:
        kv2 = jnp.pad(kv2, ((0, 0), (0, 0), (0, dc_pad - dc)))

    p_blk = _choose_p_blk(p2, topk, dc_pad, itemsize)
    rows = p_blk * topk
    n_pb = p2 // p_blk

    kv_block_bytes = p2 * dc_pad * itemsize       # whole kv[b] slab, staged per batch
    out_block_bytes = rows * dc_pad * itemsize
    # TODO(synk): tile dc when kv[b] is too large to stage in VMEM (fine for BiFormer sizes).
    assert 2 * (kv_block_bytes + out_block_bytes) <= 40 << 20, "kv[b] too large for VMEM staging"

    # Flatten + clamp indices before SMEM prefetch.  Clamping guards against
    # out-of-bounds dynamic-slice reads (VMEM accesses are unchecked); the reference's
    # behaviour for bad routing indices is undefined anyway.
    idx_flat = jnp.clip(r_idx.reshape(-1).astype(jnp.int32), 0, p2 - 1)

    kv_spec = pl.BlockSpec((None, p2, dc_pad), lambda b, pb, *_: (b, 0, 0))
    out_spec = pl.BlockSpec((None, rows, dc_pad), lambda b, pb, *_: (b, pb, 0))

    bytes_accessed = (
        n * p2 * dc_pad * itemsize           # kv read once per batch element
        + n * p2 * topk * dc_pad * itemsize  # gathered output writeback
        + idx_flat.size * 4                  # routing indices
    )
    flops = 0

    if mul_weight == "soft":
        w_col = r_weight.reshape(n, p2 * topk, 1).astype(jnp.float32)
        w_spec = pl.BlockSpec((None, rows, 1), lambda b, pb, *_: (b, pb, 0))
        in_specs = [kv_spec, w_spec]
        args = (idx_flat, kv2, w_col)
        kernel = functools.partial(_kv_gather_kernel_soft, p2=p2, topk=topk, rows=rows)
        bytes_accessed += w_col.size * 4
        flops = n * p2 * topk * dc_pad
    else:
        in_specs = [kv_spec]
        args = (idx_flat, kv2)
        kernel = functools.partial(_kv_gather_kernel_none, p2=p2, topk=topk, rows=rows)

    grid_spec = pltpu.PrefetchScalarGridSpec(
        num_scalar_prefetch=1,
        grid=(n, n_pb),
        in_specs=in_specs,
        out_specs=out_spec,
    )

    # Explicit scoped-VMEM limit sized to the real footprint (double-buffered kv slab,
    # output block and weight column) with headroom; stays under v7x's 64 MiB and
    # v5e's/v6e's physical VMEM.
    vmem_need = 2 * (kv_block_bytes + out_block_bytes + rows * 4) + (2 << 20)
    vmem_limit = int(min(max(vmem_need, 8 << 20), 48 << 20))

    out = pl.pallas_call(
        kernel,
        grid_spec=grid_spec,
        out_shape=jax.ShapeDtypeStruct((n, p2 * topk, dc_pad), kv.dtype),
        compiler_params=pltpu.CompilerParams(
            dimension_semantics=("parallel", "arbitrary"),
            vmem_limit_bytes=vmem_limit,
        ),
        cost_estimate=pl.CostEstimate(
            flops=flops, transcendentals=0, bytes_accessed=bytes_accessed
        ),
    )(*args)

    if dc_pad != dc:
        out = out[..., :dc]
    return out.reshape(n, p2, topk, w2, c_kv)


def kv_gather_ref(r_idx, r_weight, kv, mul_weight="none"):
    """Pure-JAX reference matching the PyTorch semantics."""
    n = kv.shape[0]
    b_idx = jnp.arange(n)[:, None, None]
    out = kv[b_idx, r_idx]  # (n, p2, topk, w2, c_kv)
    if mul_weight == "soft":
        out = r_weight[..., None, None] * out
    return out


def _run_case(key, n, p2, topk, w2, c_kv):
    k1, k2, k3 = jax.random.split(key, 3)
    kv = jax.random.normal(k1, (n, p2, w2, c_kv), dtype=jnp.float32)
    r_idx = jax.random.randint(k2, (n, p2, topk), 0, p2, dtype=jnp.int32)
    r_weight = jax.nn.softmax(
        jax.random.normal(k3, (n, p2, topk), dtype=jnp.float32), axis=-1
    )
    for mode in ("none", "soft"):
        out = kv_gather(r_idx, r_weight, kv, mul_weight=mode)
        out = jax.block_until_ready(out)
        ref = kv_gather_ref(r_idx, r_weight, kv, mul_weight=mode)
        assert out.shape == (n, p2, topk, w2, c_kv)
        assert jnp.allclose(out, ref, atol=1e-6, rtol=1e-6), (
            f"mismatch in mode={mode} for shape n={n} p2={p2} topk={topk} w2={w2} c_kv={c_kv}"
        )


if __name__ == "__main__":
    key = jax.random.PRNGKey(0)
    k_a, k_b = jax.random.split(key)

    # Lane-aligned case (dc = w2*c_kv = 256, a multiple of 128).
    _run_case(k_a, n=2, p2=8, topk=4, w2=8, c_kv=32)
    # Non-aligned case exercising the dc -> 128 padding path and odd topk.
    _run_case(k_b, n=2, p2=16, topk=3, w2=7, c_kv=9)

    print("KERNEL_OK")
</pallas_src>

<mosaic_0001>
module attributes {stable_mosaic.version = 11 : i64} {
  func.func @_kv_gather_kernel_none(%arg0: i32, %arg1: i32, %arg2: memref<64xi32, #tpu.memory_space<smem>>, %arg3: memref<1x8x256xf32, #tpu.memory_space<vmem>>, %arg4: memref<1x32x256xf32, #tpu.memory_space<vmem>>) attributes {dimension_semantics = [#tpu.dimension_semantics<parallel>, #tpu.dimension_semantics<arbitrary>], iteration_bounds = array<i64: 2, 1>, scalar_prefetch = 1 : i64, scratch_operands = 0 : i64, tpu.core_type = #tpu.core_type<tc>, window_params = [{transform_indices = @transform_0, window_bounds = array<i64: 1, 8, 256>}, {transform_indices = @transform_1, window_bounds = array<i64: 1, 32, 256>}]} {
    %c32_i32 = arith.constant 32 : i32
    %0 = arith.muli %arg0, %c32_i32 : i32
    %c32_i32_0 = arith.constant 32 : i32
    %1 = arith.muli %arg1, %c32_i32_0 : i32
    %2 = arith.addi %0, %1 : i32
    %c0_i32 = arith.constant 0 : i32
    %3 = arith.addi %2, %c0_i32 : i32
    %4 = arith.index_cast %3 : i32 to index
    %5 = memref.load %arg2[%4] : memref<64xi32, #tpu.memory_space<smem>>
    %c0 = arith.constant 0 : index
    %6 = arith.index_cast %5 : i32 to index
    %c0_1 = arith.constant 0 : index
    %7 = vector.load %arg3[%c0, %6, %c0_1] : memref<1x8x256xf32, #tpu.memory_space<vmem>>, vector<1x1x256xf32>
    %8 = vector.shape_cast %7 : vector<1x1x256xf32> to vector<1x256xf32>
    %c0_2 = arith.constant 0 : index
    %c0_3 = arith.constant 0 : index
    %c0_4 = arith.constant 0 : index
    %9 = vector.load %arg4[%c0_2, %c0_3, %c0_4] : memref<1x32x256xf32, #tpu.memory_space<vmem>>, vector<1x1x256xf32>
    %10 = vector.shape_cast %9 : vector<1x1x256xf32> to vector<1x256xf32>
    %11 = vector.shape_cast %8 : vector<1x256xf32> to vector<1x1x256xf32>
    tpu.vector_store %arg4[%c0_2, %c0_3, %c0_4], %11 {strides = array<i32>} : memref<1x32x256xf32, #tpu.memory_space<vmem>>, vector<1x1x256xf32>,
    %c1_i32 = arith.constant 1 : i32
    %12 = arith.addi %2, %c1_i32 : i32
    %13 = arith.index_cast %12 : i32 to index
    %14 = memref.load %arg2[%13] : memref<64xi32, #tpu.memory_space<smem>>
    %c0_5 = arith.constant 0 : index
    %15 = arith.index_cast %14 : i32 to index
    %c0_6 = arith.constant 0 : index
    %16 = vector.load %arg3[%c0_5, %15, %c0_6] : memref<1x8x256xf32, #tpu.memory_space<vmem>>, vector<1x1x256xf32>
    %17 = vector.shape_cast %16 : vector<1x1x256xf32> to vector<1x256xf32>
    %c0_7 = arith.constant 0 : index
    %c1 = arith.constant 1 : index
    %c0_8 = arith.constant 0 : index
    %18 = vector.load %arg4[%c0_7, %c1, %c0_8] : memref<1x32x256xf32, #tpu.memory_space<vmem>>, vector<1x1x256xf32>
    %19 = vector.shape_cast %18 : vector<1x1x256xf32> to vector<1x256xf32>
    %20 = vector.shape_cast %17 : vector<1x256xf32> to vector<1x1x256xf32>
    tpu.vector_store %arg4[%c0_7, %c1, %c0_8], %20 {strides = array<i32>} : memref<1x32x256xf32, #tpu.memory_space<vmem>>, vector<1x1x256xf32>,
    %c2_i32 = arith.constant 2 : i32
    %21 = arith.addi %2, %c2_i32 : i32
    %22 = arith.index_cast %21 : i32 to index
    %23 = memref.load %arg2[%22] : memref<64xi32, #tpu.memory_space<smem>>
    %c0_9 = arith.constant 0 : index
    %24 = arith.index_cast %23 : i32 to index
    %c0_10 = arith.constant 0 : index
    %25 = vector.load %arg3[%c0_9, %24, %c0_10] : memref<1x8x256xf32, #tpu.memory_space<vmem>>, vector<1x1x256xf32>
    %26 = vector.shape_cast %25 : vector<1x1x256xf32> to vector<1x256xf32>
    %c0_11 = arith.constant 0 : index
    %c2 = arith.constant 2 : index
    %c0_12 = arith.constant 0 : index
    %27 = vector.load %arg4[%c0_11, %c2, %c0_12] : memref<1x32x256xf32, #tpu.memory_space<vmem>>, vector<1x1x256xf32>
    %28 = vector.shape_cast %27 : vector<1x1x256xf32> to vector<1x256xf32>
    %29 = vector.shape_cast %26 : vector<1x256xf32> to vector<1x1x256xf32>
    tpu.vector_store %arg4[%c0_11, %c2, %c0_12], %29 {strides = array<i32>} : memref<1x32x256xf32, #tpu.memory_space<vmem>>, vector<1x1x256xf32>,
    %c3_i32 = arith.constant 3 : i32
    %30 = arith.addi %2, %c3_i32 : i32
    %31 = arith.index_cast %30 : i32 to index
    %32 = memref.load %arg2[%31] : memref<64xi32, #tpu.memory_space<smem>>
    %c0_13 = arith.constant 0 : index
    %33 = arith.index_cast %32 : i32 to index
    %c0_14 = arith.constant 0 : index
    %34 = vector.load %arg3[%c0_13, %33, %c0_14] : memref<1x8x256xf32, #tpu.memory_space<vmem>>, vector<1x1x256xf32>
    %35 = vector.shape_cast %34 : vector<1x1x256xf32> to vector<1x256xf32>
    %c0_15 = arith.constant 0 : index
    %c3 = arith.constant 3 : index
    %c0_16 = arith.constant 0 : index
    %36 = vector.load %arg4[%c0_15, %c3, %c0_16] : memref<1x32x256xf32, #tpu.memory_space<vmem>>, vector<1x1x256xf32>
    %37 = vector.shape_cast %36 : vector<1x1x256xf32> to vector<1x256xf32>
    %38 = vector.shape_cast %35 : vector<1x256xf32> to vector<1x1x256xf32>
    tpu.vector_store %arg4[%c0_15, %c3, %c0_16], %38 {strides = array<i32>} : memref<1x32x256xf32, #tpu.memory_space<vmem>>, vector<1x1x256xf32>,
    %c4_i32 = arith.constant 4 : i32
    %39 = arith.addi %2, %c4_i32 : i32
    %40 = arith.index_cast %39 : i32 to index
    %41 = memref.load %arg2[%40] : memref<64xi32, #tpu.memory_space<smem>>
    %c0_17 = arith.constant 0 : index
    %42 = arith.index_cast %41 : i32 to index
    %c0_18 = arith.constant 0 : index
    %43 = vector.load %arg3[%c0_17, %42, %c0_18] : memref<1x8x256xf32, #tpu.memory_space<vmem>>, vector<1x1x256xf32>
    %44 = vector.shape_cast %43 : vector<1x1x256xf32> to vector<1x256xf32>
    %c0_19 = arith.constant 0 : index
    %c4 = arith.constant 4 : index
    %c0_20 = arith.constant 0 : index
    %45 = vector.load %arg4[%c0_19, %c4, %c0_20] : memref<1x32x256xf32, #tpu.memory_space<vmem>>, vector<1x1x256xf32>
    %46 = vector.shape_cast %45 : vector<1x1x256xf32> to vector<1x256xf32>
    %47 = vector.shape_cast %44 : vector<1x256xf32> to vector<1x1x256xf32>
    tpu.vector_store %arg4[%c0_19, %c4, %c0_20], %47 {strides = array<i32>} : memref<1x32x256xf32, #tpu.memory_space<vmem>>, vector<1x1x256xf32>,
    %c5_i32 = arith.constant 5 : i32
    %48 = arith.addi %2, %c5_i32 : i32
    %49 = arith.index_cast %48 : i32 to index
    %50 = memref.load %arg2[%49] : memref<64xi32, #tpu.memory_space<smem>>
    %c0_21 = arith.constant 0 : index
    %51 = arith.index_cast %50 : i32 to index
    %c0_22 = arith.constant 0 : index
    %52 = vector.load %arg3[%c0_21, %51, %c0_22] : memref<1x8x256xf32, #tpu.memory_space<vmem>>, vector<1x1x256xf32>
    %53 = vector.shape_cast %52 : vector<1x1x256xf32> to vector<1x256xf32>
    %c0_23 = arith.constant 0 : index
    %c5 = arith.constant 5 : index
    %c0_24 = arith.constant 0 : index
    %54 = vector.load %arg4[%c0_23, %c5, %c0_24] : memref<1x32x256xf32, #tpu.memory_space<vmem>>, vector<1x1x256xf32>
    %55 = vector.shape_cast %54 : vector<1x1x256xf32> to vector<1x256xf32>
    %56 = vector.shape_cast %53 : vector<1x256xf32> to vector<1x1x256xf32>
    tpu.vector_store %arg4[%c0_23, %c5, %c0_24], %56 {strides = array<i32>} : memref<1x32x256xf32, #tpu.memory_space<vmem>>, vector<1x1x256xf32>,
    %c6_i32 = arith.constant 6 : i32
    %57 = arith.addi %2, %c6_i32 : i32
    %58 = arith.index_cast %57 : i32 to index
    %59 = memref.load %arg2[%58] : memref<64xi32, #tpu.memory_space<smem>>
    %c0_25 = arith.constant 0 : index
    %60 = arith.index_cast %59 : i32 to index
    %c0_26 = arith.constant 0 : index
    %61 = vector.load %arg3[%c0_25, %60, %c0_26] : memref<1x8x256xf32, #tpu.memory_space<vmem>>, vector<1x1x256xf32>
    %62 = vector.shape_cast %61 : vector<1x1x256xf32> to vector<1x256xf32>
    %c0_27 = arith.constant 0 : index
    %c6 = arith.constant 6 : index
    %c0_28 = arith.constant 0 : index
    %63 = vector.load %arg4[%c0_27, %c6, %c0_28] : memref<1x32x256xf32, #tpu.memory_space<vmem>>, vector<1x1x256xf32>
    %64 = vector.shape_cast %63 : vector<1x1x256xf32> to vector<1x256xf32>
    %65 = vector.shape_cast %62 : vector<1x256xf32> to vector<1x1x256xf32>
    tpu.vector_store %arg4[%c0_27, %c6, %c0_28], %65 {strides = array<i32>} : memref<1x32x256xf32, #tpu.memory_space<vmem>>, vector<1x1x256xf32>,
    %c7_i32 = arith.constant 7 : i32
    %66 = arith.addi %2, %c7_i32 : i32
    %67 = arith.index_cast %66 : i32 to index
    %68 = memref.load %arg2[%67] : memref<64xi32, #tpu.memory_space<smem>>
    %c0_29 = arith.constant 0 : index
    %69 = arith.index_cast %68 : i32 to index
    %c0_30 = arith.constant 0 : index
    %70 = vector.load %arg3[%c0_29, %69, %c0_30] : memref<1x8x256xf32, #tpu.memory_space<vmem>>, vector<1x1x256xf32>
    %71 = vector.shape_cast %70 : vector<1x1x256xf32> to vector<1x256xf32>
    %c0_31 = arith.constant 0 : index
    %c7 = arith.constant 7 : index
    %c0_32 = arith.constant 0 : index
    %72 = vector.load %arg4[%c0_31, %c7, %c0_32] : memref<1x32x256xf32, #tpu.memory_space<vmem>>, vector<1x1x256xf32>
    %73 = vector.shape_cast %72 : vector<1x1x256xf32> to vector<1x256xf32>
    %74 = vector.shape_cast %71 : vector<1x256xf32> to vector<1x1x256xf32>
    tpu.vector_store %arg4[%c0_31, %c7, %c0_32], %74 {strides = array<i32>} : memref<1x32x256xf32, #tpu.memory_space<vmem>>, vector<1x1x256xf32>,
    %c8_i32 = arith.constant 8 : i32
    %75 = arith.addi %2, %c8_i32 : i32
    %76 = arith.index_cast %75 : i32 to index
    %77 = memref.load %arg2[%76] : memref<64xi32, #tpu.memory_space<smem>>
    %c0_33 = arith.constant 0 : index
    %78 = arith.index_cast %77 : i32 to index
    %c0_34 = arith.constant 0 : index
    %79 = vector.load %arg3[%c0_33, %78, %c0_34] : memref<1x8x256xf32, #tpu.memory_space<vmem>>, vector<1x1x256xf32>
    %80 = vector.shape_cast %79 : vector<1x1x256xf32> to vector<1x256xf32>
    %c0_35 = arith.constant 0 : index
    %c8 = arith.constant 8 : index
    %c0_36 = arith.constant 0 : index
    %81 = vector.load %arg4[%c0_35, %c8, %c0_36] : memref<1x32x256xf32, #tpu.memory_space<vmem>>, vector<1x1x256xf32>
    %82 = vector.shape_cast %81 : vector<1x1x256xf32> to vector<1x256xf32>
    %83 = vector.shape_cast %80 : vector<1x256xf32> to vector<1x1x256xf32>
    tpu.vector_store %arg4[%c0_35, %c8, %c0_36], %83 {strides = array<i32>} : memref<1x32x256xf32, #tpu.memory_space<vmem>>, vector<1x1x256xf32>,
    %c9_i32 = arith.constant 9 : i32
    %84 = arith.addi %2, %c9_i32 : i32
    %85 = arith.index_cast %84 : i32 to index
    %86 = memref.load %arg2[%85] : memref<64xi32, #tpu.memory_space<smem>>
    %c0_37 = arith.constant 0 : index
    %87 = arith.index_cast %86 : i32 to index
    %c0_38 = arith.constant 0 : index
    %88 = vector.load %arg3[%c0_37, %87, %c0_38] : memref<1x8x256xf32, #tpu.memory_space<vmem>>, vector<1x1x256xf32>
    %89 = vector.shape_cast %88 : vector<1x1x256xf32> to vector<1x256xf32>
    %c0_39 = arith.constant 0 : index
    %c9 = arith.constant 9 : index
    %c0_40 = arith.constant 0 : index
    %90 = vector.load %arg4[%c0_39, %c9, %c0_40] : memref<1x32x256xf32, #tpu.memory_space<vmem>>, vector<1x1x256xf32>
    %91 = vector.shape_cast %90 : vector<1x1x256xf32> to vector<1x256xf32>
    %92 = vector.shape_cast %89 : vector<1x256xf32> to vector<1x1x256xf32>
    tpu.vector_store %arg4[%c0_39, %c9, %c0_40], %92 {strides = array<i32>} : memref<1x32x256xf32, #tpu.memory_space<vmem>>, vector<1x1x256xf32>,
    %c10_i32 = arith.constant 10 : i32
    %93 = arith.addi %2, %c10_i32 : i32
    %94 = arith.index_cast %93 : i32 to index
    %95 = memref.load %arg2[%94] : memref<64xi32, #tpu.memory_space<smem>>
    %c0_41 = arith.constant 0 : index
    %96 = arith.index_cast %95 : i32 to index
    %c0_42 = arith.constant 0 : index
    %97 = vector.load %arg3[%c0_41, %96, %c0_42] : memref<1x8x256xf32, #tpu.memory_space<vmem>>, vector<1x1x256xf32>
    %98 = vector.shape_cast %97 : vector<1x1x256xf32> to vector<1x256xf32>
    %c0_43 = arith.constant 0 : index
    %c10 = arith.constant 10 : index
    %c0_44 = arith.constant 0 : index
    %99 = vector.load %arg4[%c0_43, %c10, %c0_44] : memref<1x32x256xf32, #tpu.memory_space<vmem>>, vector<1x1x256xf32>
    %100 = vector.shape_cast %99 : vector<1x1x256xf32> to vector<1x256xf32>
    %101 = vector.shape_cast %98 : vector<1x256xf32> to vector<1x1x256xf32>
    tpu.vector_store %arg4[%c0_43, %c10, %c0_44], %101 {strides = array<i32>} : memref<1x32x256xf32, #tpu.memory_space<vmem>>, vector<1x1x256xf32>,
    %c11_i32 = arith.constant 11 : i32
    %102 = arith.addi %2, %c11_i32 : i32
    %103 = arith.index_cast %102 : i32 to index
    %104 = memref.load %arg2[%103] : memref<64xi32, #tpu.memory_space<smem>>
    %c0_45 = arith.constant 0 : index
    %105 = arith.index_cast %104 : i32 to index
    %c0_46 = arith.constant 0 : index
    %106 = vector.load %arg3[%c0_45, %105, %c0_46] : memref<1x8x256xf32, #tpu.memory_space<vmem>>, vector<1x1x256xf32>
    %107 = vector.shape_cast %106 : vector<1x1x256xf32> to vector<1x256xf32>
    %c0_47 = arith.constant 0 : index
    %c11 = arith.constant 11 : index
    %c0_48 = arith.constant 0 : index
    %108 = vector.load %arg4[%c0_47, %c11, %c0_48] : memref<1x32x256xf32, #tpu.memory_space<vmem>>, vector<1x1x256xf32>
    %109 = vector.shape_cast %108 : vector<1x1x256xf32> to vector<1x256xf32>
    %110 = vector.shape_cast %107 : vector<1x256xf32> to vector<1x1x256xf32>
    tpu.vector_store %arg4[%c0_47, %c11, %c0_48], %110 {strides = array<i32>} : memref<1x32x256xf32, #tpu.memory_space<vmem>>, vector<1x1x256xf32>,
    %c12_i32 = arith.constant 12 : i32
    %111 = arith.addi %2, %c12_i32 : i32
    %112 = arith.index_cast %111 : i32 to index
    %113 = memref.load %arg2[%112] : memref<64xi32, #tpu.memory_space<smem>>
    %c0_49 = arith.constant 0 : index
    %114 = arith.index_cast %113 : i32 to index
    %c0_50 = arith.constant 0 : index
    %115 = vector.load %arg3[%c0_49, %114, %c0_50] : memref<1x8x256xf32, #tpu.memory_space<vmem>>, vector<1x1x256xf32>
    %116 = vector.shape_cast %115 : vector<1x1x256xf32> to vector<1x256xf32>
    %c0_51 = arith.constant 0 : index
    %c12 = arith.constant 12 : index
    %c0_52 = arith.constant 0 : index
    %117 = vector.load %arg4[%c0_51, %c12, %c0_52] : memref<1x32x256xf32, #tpu.memory_space<vmem>>, vector<1x1x256xf32>
    %118 = vector.shape_cast %117 : vector<1x1x256xf32> to vector<1x256xf32>
    %119 = vector.shape_cast %116 : vector<1x256xf32> to vector<1x1x256xf32>
    tpu.vector_store %arg4[%c0_51, %c12, %c0_52], %119 {strides = array<i32>} : memref<1x32x256xf32, #tpu.memory_space<vmem>>, vector<1x1x256xf32>,
    %c13_i32 = arith.constant 13 : i32
    %120 = arith.addi %2, %c13_i32 : i32
    %121 = arith.index_cast %120 : i32 to index
    %122 = memref.load %arg2[%121] : memref<64xi32, #tpu.memory_space<smem>>
    %c0_53 = arith.constant 0 : index
    %123 = arith.index_cast %122 : i32 to index
    %c0_54 = arith.constant 0 : index
    %124 = vector.load %arg3[%c0_53, %123, %c0_54] : memref<1x8x256xf32, #tpu.memory_space<vmem>>, vector<1x1x256xf32>
    %125 = vector.shape_cast %124 : vector<1x1x256xf32> to vector<1x256xf32>
    %c0_55 = arith.constant 0 : index
    %c13 = arith.constant 13 : index
    %c0_56 = arith.constant 0 : index
    %126 = vector.load %arg4[%c0_55, %c13, %c0_56] : memref<1x32x256xf32, #tpu.memory_space<vmem>>, vector<1x1x256xf32>
    %127 = vector.shape_cast %126 : vector<1x1x256xf32> to vector<1x256xf32>
    %128 = vector.shape_cast %125 : vector<1x256xf32> to vector<1x1x256xf32>
    tpu.vector_store %arg4[%c0_55, %c13, %c0_56], %128 {strides = array<i32>} : memref<1x32x256xf32, #tpu.memory_space<vmem>>, vector<1x1x256xf32>,
    %c14_i32 = arith.constant 14 : i32
    %129 = arith.addi %2, %c14_i32 : i32
    %130 = arith.index_cast %129 : i32 to index
    %131 = memref.load %arg2[%130] : memref<64xi32, #tpu.memory_space<smem>>
    %c0_57 = arith.constant 0 : index
    %132 = arith.index_cast %131 : i32 to index
    %c0_58 = arith.constant 0 : index
    %133 = vector.load %arg3[%c0_57, %132, %c0_58] : memref<1x8x256xf32, #tpu.memory_space<vmem>>, vector<1x1x256xf32>
    %134 = vector.shape_cast %133 : vector<1x1x256xf32> to vector<1x256xf32>
    %c0_59 = arith.constant 0 : index
    %c14 = arith.constant 14 : index
    %c0_60 = arith.constant 0 : index
    %135 = vector.load %arg4[%c0_59, %c14, %c0_60] : memref<1x32x256xf32, #tpu.memory_space<vmem>>, vector<1x1x256xf32>
    %136 = vector.shape_cast %135 : vector<1x1x256xf32> to vector<1x256xf32>
    %137 = vector.shape_cast %134 : vector<1x256xf32> to vector<1x1x256xf32>
    tpu.vector_store %arg4[%c0_59, %c14, %c0_60], %137 {strides = array<i32>} : memref<1x32x256xf32, #tpu.memory_space<vmem>>, vector<1x1x256xf32>,
    %c15_i32 = arith.constant 15 : i32
    %138 = arith.addi %2, %c15_i32 : i32
    %139 = arith.index_cast %138 : i32 to index
    %140 = memref.load %arg2[%139] : memref<64xi32, #tpu.memory_space<smem>>
    %c0_61 = arith.constant 0 : index
    %141 = arith.index_cast %140 : i32 to index
    %c0_62 = arith.constant 0 : index
    %142 = vector.load %arg3[%c0_61, %141, %c0_62] : memref<1x8x256xf32, #tpu.memory_space<vmem>>, vector<1x1x256xf32>
    %143 = vector.shape_cast %142 : vector<1x1x256xf32> to vector<1x256xf32>
    %c0_63 = arith.constant 0 : index
    %c15 = arith.constant 15 : index
    %c0_64 = arith.constant 0 : index
    %144 = vector.load %arg4[%c0_63, %c15, %c0_64] : memref<1x32x256xf32, #tpu.memory_space<vmem>>, vector<1x1x256xf32>
    %145 = vector.shape_cast %144 : vector<1x1x256xf32> to vector<1x256xf32>
    %146 = vector.shape_cast %143 : vector<1x256xf32> to vector<1x1x256xf32>
    tpu.vector_store %arg4[%c0_63, %c15, %c0_64], %146 {strides = array<i32>} : memref<1x32x256xf32, #tpu.memory_space<vmem>>, vector<1x1x256xf32>,
    %c16_i32 = arith.constant 16 : i32
    %147 = arith.addi %2, %c16_i32 : i32
    %148 = arith.index_cast %147 : i32 to index
    %149 = memref.load %arg2[%148] : memref<64xi32, #tpu.memory_space<smem>>
    %c0_65 = arith.constant 0 : index
    %150 = arith.index_cast %149 : i32 to index
    %c0_66 = arith.constant 0 : index
    %151 = vector.load %arg3[%c0_65, %150, %c0_66] : memref<1x8x256xf32, #tpu.memory_space<vmem>>, vector<1x1x256xf32>
    %152 = vector.shape_cast %151 : vector<1x1x256xf32> to vector<1x256xf32>
    %c0_67 = arith.constant 0 : index
    %c16 = arith.constant 16 : index
    %c0_68 = arith.constant 0 : index
    %153 = vector.load %arg4[%c0_67, %c16, %c0_68] : memref<1x32x256xf32, #tpu.memory_space<vmem>>, vector<1x1x256xf32>
    %154 = vector.shape_cast %153 : vector<1x1x256xf32> to vector<1x256xf32>
    %155 = vector.shape_cast %152 : vector<1x256xf32> to vector<1x1x256xf32>
    tpu.vector_store %arg4[%c0_67, %c16, %c0_68], %155 {strides = array<i32>} : memref<1x32x256xf32, #tpu.memory_space<vmem>>, vector<1x1x256xf32>,
    %c17_i32 = arith.constant 17 : i32
    %156 = arith.addi %2, %c17_i32 : i32
    %157 = arith.index_cast %156 : i32 to index
    %158 = memref.load %arg2[%157] : memref<64xi32, #tpu.memory_space<smem>>
    %c0_69 = arith.constant 0 : index
    %159 = arith.index_cast %158 : i32 to index
    %c0_70 = arith.constant 0 : index
    %160 = vector.load %arg3[%c0_69, %159, %c0_70] : memref<1x8x256xf32, #tpu.memory_space<vmem>>, vector<1x1x256xf32>
    %161 = vector.shape_cast %160 : vector<1x1x256xf32> to vector<1x256xf32>
    %c0_71 = arith.constant 0 : index
    %c17 = arith.constant 17 : index
    %c0_72 = arith.constant 0 : index
    %162 = vector.load %arg4[%c0_71, %c17, %c0_72] : memref<1x32x256xf32, #tpu.memory_space<vmem>>, vector<1x1x256xf32>
    %163 = vector.shape_cast %162 : vector<1x1x256xf32> to vector<1x256xf32>
    %164 = vector.shape_cast %161 : vector<1x256xf32> to vector<1x1x256xf32>
    tpu.vector_store %arg4[%c0_71, %c17, %c0_72], %164 {strides = array<i32>} : memref<1x32x256xf32, #tpu.memory_space<vmem>>, vector<1x1x256xf32>,
    %c18_i32 = arith.constant 18 : i32
    %165 = arith.addi %2, %c18_i32 : i32
    %166 = arith.index_cast %165 : i32 to index
    %167 = memref.load %arg2[%166] : memref<64xi32, #tpu.memory_space<smem>>
    %c0_73 = arith.constant 0 : index
    %168 = arith.index_cast %167 : i32 to index
    %c0_74 = arith.constant 0 : index
    %169 = vector.load %arg3[%c0_73, %168, %c0_74] : memref<1x8x256xf32, #tpu.memory_space<vmem>>, vector<1x1x256xf32>
    %170 = vector.shape_cast %169 : vector<1x1x256xf32> to vector<1x256xf32>
    %c0_75 = arith.constant 0 : index
    %c18 = arith.constant 18 : index
    %c0_76 = arith.constant 0 : index
    %171 = vector.load %arg4[%c0_75, %c18, %c0_76] : memref<1x32x256xf32, #tpu.memory_space<vmem>>, vector<1x1x256xf32>
    %172 = vector.shape_cast %171 : vector<1x1x256xf32> to vector<1x256xf32>
    %173 = vector.shape_cast %170 : vector<1x256xf32> to vector<1x1x256xf32>
    tpu.vector_store %arg4[%c0_75, %c18, %c0_76], %173 {strides = array<i32>} : memref<1x32x256xf32, #tpu.memory_space<vmem>>, vector<1x1x256xf32>,
    %c19_i32 = arith.constant 19 : i32
    %174 = arith.addi %2, %c19_i32 : i32
    %175 = arith.index_cast %174 : i32 to index
    %176 = memref.load %arg2[%175] : memref<64xi32, #tpu.memory_space<smem>>
    %c0_77 = arith.constant 0 : index
    %177 = arith.index_cast %176 : i32 to index
    %c0_78 = arith.constant 0 : index
    %178 = vector.load %arg3[%c0_77, %177, %c0_78] : memref<1x8x256xf32, #tpu.memory_space<vmem>>, vector<1x1x256xf32>
    %179 = vector.shape_cast %178 : vector<1x1x256xf32> to vector<1x256xf32>
    %c0_79 = arith.constant 0 : index
    %c19 = arith.constant 19 : index
    %c0_80 = arith.constant 0 : index
    %180 = vector.load %arg4[%c0_79, %c19, %c0_80] : memref<1x32x256xf32, #tpu.memory_space<vmem>>, vector<1x1x256xf32>
    %181 = vector.shape_cast %180 : vector<1x1x256xf32> to vector<1x256xf32>
    %182 = vector.shape_cast %179 : vector<1x256xf32> to vector<1x1x256xf32>
    tpu.vector_store %arg4[%c0_79, %c19, %c0_80], %182 {strides = array<i32>} : memref<1x32x256xf32, #tpu.memory_space<vmem>>, vector<1x1x256xf32>,
    %c20_i32 = arith.constant 20 : i32
    %183 = arith.addi %2, %c20_i32 : i32
    %184 = arith.index_cast %183 : i32 to index
    %185 = memref.load %arg2[%184] : memref<64xi32, #tpu.memory_space<smem>>
    %c0_81 = arith.constant 0 : index
    %186 = arith.index_cast %185 : i32 to index
    %c0_82 = arith.constant 0 : index
    %187 = vector.load %arg3[%c0_81, %186, %c0_82] : memref<1x8x256xf32, #tpu.memory_space<vmem>>, vector<1x1x256xf32>
    %188 = vector.shape_cast %187 : vector<1x1x256xf32> to vector<1x256xf32>
    %c0_83 = arith.constant 0 : index
    %c20 = arith.constant 20 : index
    %c0_84 = arith.constant 0 : index
    %189 = vector.load %arg4[%c0_83, %c20, %c0_84] : memref<1x32x256xf32, #tpu.memory_space<vmem>>, vector<1x1x256xf32>
    %190 = vector.shape_cast %189 : vector<1x1x256xf32> to vector<1x256xf32>
    %191 = vector.shape_cast %188 : vector<1x256xf32> to vector<1x1x256xf32>
    tpu.vector_store %arg4[%c0_83, %c20, %c0_84], %191 {strides = array<i32>} : memref<1x32x256xf32, #tpu.memory_space<vmem>>, vector<1x1x256xf32>,
    %c21_i32 = arith.constant 21 : i32
    %192 = arith.addi %2, %c21_i32 : i32
    %193 = arith.index_cast %192 : i32 to index
    %194 = memref.load %arg2[%193] : memref<64xi32, #tpu.memory_space<smem>>
    %c0_85 = arith.constant 0 : index
    %195 = arith.index_cast %194 : i32 to index
    %c0_86 = arith.constant 0 : index
    %196 = vector.load %arg3[%c0_85, %195, %c0_86] : memref<1x8x256xf32, #tpu.memory_space<vmem>>, vector<1x1x256xf32>
    %197 = vector.shape_cast %196 : vector<1x1x256xf32> to vector<1x256xf32>
    %c0_87 = arith.constant 0 : index
    %c21 = arith.constant 21 : index
    %c0_88 = arith.constant 0 : index
    %198 = vector.load %arg4[%c0_87, %c21, %c0_88] : memref<1x32x256xf32, #tpu.memory_space<vmem>>, vector<1x1x256xf32>
    %199 = vector.shape_cast %198 : vector<1x1x256xf32> to vector<1x256xf32>
    %200 = vector.shape_cast %197 : vector<1x256xf32> to vector<1x1x256xf32>
    tpu.vector_store %arg4[%c0_87, %c21, %c0_88], %200 {strides = array<i32>} : memref<1x32x256xf32, #tpu.memory_space<vmem>>, vector<1x1x256xf32>,
    %c22_i32 = arith.constant 22 : i32
    %201 = arith.addi %2, %c22_i32 : i32
    %202 = arith.index_cast %201 : i32 to index
    %203 = memref.load %arg2[%202] : memref<64xi32, #tpu.memory_space<smem>>
    %c0_89 = arith.constant 0 : index
    %204 = arith.index_cast %203 : i32 to index
    %c0_90 = arith.constant 0 : index
    %205 = vector.load %arg3[%c0_89, %204, %c0_90] : memref<1x8x256xf32, #tpu.memory_space<vmem>>, vector<1x1x256xf32>
    %206 = vector.shape_cast %205 : vector<1x1x256xf32> to vector<1x256xf32>
    %c0_91 = arith.constant 0 : index
    %c22 = arith.constant 22 : index
    %c0_92 = arith.constant 0 : index
    %207 = vector.load %arg4[%c0_91, %c22, %c0_92] : memref<1x32x256xf32, #tpu.memory_space<vmem>>, vector<1x1x256xf32>
    %208 = vector.shape_cast %207 : vector<1x1x256xf32> to vector<1x256xf32>
    %209 = vector.shape_cast %206 : vector<1x256xf32> to vector<1x1x256xf32>
    tpu.vector_store %arg4[%c0_91, %c22, %c0_92], %209 {strides = array<i32>} : memref<1x32x256xf32, #tpu.memory_space<vmem>>, vector<1x1x256xf32>,
    %c23_i32 = arith.constant 23 : i32
    %210 = arith.addi %2, %c23_i32 : i32
    %211 = arith.index_cast %210 : i32 to index
    %212 = memref.load %arg2[%211] : memref<64xi32, #tpu.memory_space<smem>>
    %c0_93 = arith.constant 0 : index
    %213 = arith.index_cast %212 : i32 to index
    %c0_94 = arith.constant 0 : index
    %214 = vector.load %arg3[%c0_93, %213, %c0_94] : memref<1x8x256xf32, #tpu.memory_space<vmem>>, vector<1x1x256xf32>
    %215 = vector.shape_cast %214 : vector<1x1x256xf32> to vector<1x256xf32>
    %c0_95 = arith.constant 0 : index
    %c23 = arith.constant 23 : index
    %c0_96 = arith.constant 0 : index
    %216 = vector.load %arg4[%c0_95, %c23, %c0_96] : memref<1x32x256xf32, #tpu.memory_space<vmem>>, vector<1x1x256xf32>
    %217 = vector.shape_cast %216 : vector<1x1x256xf32> to vector<1x256xf32>
    %218 = vector.shape_cast %215 : vector<1x256xf32> to vector<1x1x256xf32>
    tpu.vector_store %arg4[%c0_95, %c23, %c0_96], %218 {strides = array<i32>} : memref<1x32x256xf32, #tpu.memory_space<vmem>>, vector<1x1x256xf32>,
    %c24_i32 = arith.constant 24 : i32
    %219 = arith.addi %2, %c24_i32 : i32
    %220 = arith.index_cast %219 : i32 to index
    %221 = memref.load %arg2[%220] : memref<64xi32, #tpu.memory_space<smem>>
    %c0_97 = arith.constant 0 : index
    %222 = arith.index_cast %221 : i32 to index
    %c0_98 = arith.constant 0 : index
    %223 = vector.load %arg3[%c0_97, %222, %c0_98] : memref<1x8x256xf32, #tpu.memory_space<vmem>>, vector<1x1x256xf32>
    %224 = vector.shape_cast %223 : vector<1x1x256xf32> to vector<1x256xf32>
    %c0_99 = arith.constant 0 : index
    %c24 = arith.constant 24 : index
    %c0_100 = arith.constant 0 : index
    %225 = vector.load %arg4[%c0_99, %c24, %c0_100] : memref<1x32x256xf32, #tpu.memory_space<vmem>>, vector<1x1x256xf32>
    %226 = vector.shape_cast %225 : vector<1x1x256xf32> to vector<1x256xf32>
    %227 = vector.shape_cast %224 : vector<1x256xf32> to vector<1x1x256xf32>
    tpu.vector_store %arg4[%c0_99, %c24, %c0_100], %227 {strides = array<i32>} : memref<1x32x256xf32, #tpu.memory_space<vmem>>, vector<1x1x256xf32>,
    %c25_i32 = arith.constant 25 : i32
    %228 = arith.addi %2, %c25_i32 : i32
    %229 = arith.index_cast %228 : i32 to index
    %230 = memref.load %arg2[%229] : memref<64xi32, #tpu.memory_space<smem>>
    %c0_101 = arith.constant 0 : index
    %231 = arith.index_cast %230 : i32 to index
    %c0_102 = arith.constant 0 : index
    %232 = vector.load %arg3[%c0_101, %231, %c0_102] : memref<1x8x256xf32, #tpu.memory_space<vmem>>, vector<1x1x256xf32>
    %233 = vector.shape_cast %232 : vector<1x1x256xf32> to vector<1x256xf32>
    %c0_103 = arith.constant 0 : index
    %c25 = arith.constant 25 : index
    %c0_104 = arith.constant 0 : index
    %234 = vector.load %arg4[%c0_103, %c25, %c0_104] : memref<1x32x256xf32, #tpu.memory_space<vmem>>, vector<1x1x256xf32>
    %235 = vector.shape_cast %234 : vector<1x1x256xf32> to vector<1x256xf32>
    %236 = vector.shape_cast %233 : vector<1x256xf32> to vector<1x1x256xf32>
    tpu.vector_store %arg4[%c0_103, %c25, %c0_104], %236 {strides = array<i32>} : memref<1x32x256xf32, #tpu.memory_space<vmem>>, vector<1x1x256xf32>,
    %c26_i32 = arith.constant 26 : i32
    %237 = arith.addi %2, %c26_i32 : i32
    %238 = arith.index_cast %237 : i32 to index
    %239 = memref.load %arg2[%238] : memref<64xi32, #tpu.memory_space<smem>>
    %c0_105 = arith.constant 0 : index
    %240 = arith.index_cast %239 : i32 to index
    %c0_106 = arith.constant 0 : index
    %241 = vector.load %arg3[%c0_105, %240, %c0_106] : memref<1x8x256xf32, #tpu.memory_space<vmem>>, vector<1x1x256xf32>
    %242 = vector.shape_cast %241 : vector<1x1x256xf32> to vector<1x256xf32>
    %c0_107 = arith.constant 0 : index
    %c26 = arith.constant 26 : index
    %c0_108 = arith.constant 0 : index
    %243 = vector.load %arg4[%c0_107, %c26, %c0_108] : memref<1x32x256xf32, #tpu.memory_space<vmem>>, vector<1x1x256xf32>
    %244 = vector.shape_cast %243 : vector<1x1x256xf32> to vector<1x256xf32>
    %245 = vector.shape_cast %242 : vector<1x256xf32> to vector<1x1x256xf32>
    tpu.vector_store %arg4[%c0_107, %c26, %c0_108], %245 {strides = array<i32>} : memref<1x32x256xf32, #tpu.memory_space<vmem>>, vector<1x1x256xf32>,
    %c27_i32 = arith.constant 27 : i32
    %246 = arith.addi %2, %c27_i32 : i32
    %247 = arith.index_cast %246 : i32 to index
    %248 = memref.load %arg2[%247] : memref<64xi32, #tpu.memory_space<smem>>
    %c0_109 = arith.constant 0 : index
    %249 = arith.index_cast %248 : i32 to index
    %c0_110 = arith.constant 0 : index
    %250 = vector.load %arg3[%c0_109, %249, %c0_110] : memref<1x8x256xf32, #tpu.memory_space<vmem>>, vector<1x1x256xf32>
    %251 = vector.shape_cast %250 : vector<1x1x256xf32> to vector<1x256xf32>
    %c0_111 = arith.constant 0 : index
    %c27 = arith.constant 27 : index
    %c0_112 = arith.constant 0 : index
    %252 = vector.load %arg4[%c0_111, %c27, %c0_112] : memref<1x32x256xf32, #tpu.memory_space<vmem>>, vector<1x1x256xf32>
    %253 = vector.shape_cast %252 : vector<1x1x256xf32> to vector<1x256xf32>
    %254 = vector.shape_cast %251 : vector<1x256xf32> to vector<1x1x256xf32>
    tpu.vector_store %arg4[%c0_111, %c27, %c0_112], %254 {strides = array<i32>} : memref<1x32x256xf32, #tpu.memory_space<vmem>>, vector<1x1x256xf32>,
    %c28_i32 = arith.constant 28 : i32
    %255 = arith.addi %2, %c28_i32 : i32
    %256 = arith.index_cast %255 : i32 to index
    %257 = memref.load %arg2[%256] : memref<64xi32, #tpu.memory_space<smem>>
    %c0_113 = arith.constant 0 : index
    %258 = arith.index_cast %257 : i32 to index
    %c0_114 = arith.constant 0 : index
    %259 = vector.load %arg3[%c0_113, %258, %c0_114] : memref<1x8x256xf32, #tpu.memory_space<vmem>>, vector<1x1x256xf32>
    %260 = vector.shape_cast %259 : vector<1x1x256xf32> to vector<1x256xf32>
    %c0_115 = arith.constant 0 : index
    %c28 = arith.constant 28 : index
    %c0_116 = arith.constant 0 : index
    %261 = vector.load %arg4[%c0_115, %c28, %c0_116] : memref<1x32x256xf32, #tpu.memory_space<vmem>>, vector<1x1x256xf32>
    %262 = vector.shape_cast %261 : vector<1x1x256xf32> to vector<1x256xf32>
    %263 = vector.shape_cast %260 : vector<1x256xf32> to vector<1x1x256xf32>
    tpu.vector_store %arg4[%c0_115, %c28, %c0_116], %263 {strides = array<i32>} : memref<1x32x256xf32, #tpu.memory_space<vmem>>, vector<1x1x256xf32>,
    %c29_i32 = arith.constant 29 : i32
    %264 = arith.addi %2, %c29_i32 : i32
    %265 = arith.index_cast %264 : i32 to index
    %266 = memref.load %arg2[%265] : memref<64xi32, #tpu.memory_space<smem>>
    %c0_117 = arith.constant 0 : index
    %267 = arith.index_cast %266 : i32 to index
    %c0_118 = arith.constant 0 : index
    %268 = vector.load %arg3[%c0_117, %267, %c0_118] : memref<1x8x256xf32, #tpu.memory_space<vmem>>, vector<1x1x256xf32>
    %269 = vector.shape_cast %268 : vector<1x1x256xf32> to vector<1x256xf32>
    %c0_119 = arith.constant 0 : index
    %c29 = arith.constant 29 : index
    %c0_120 = arith.constant 0 : index
    %270 = vector.load %arg4[%c0_119, %c29, %c0_120] : memref<1x32x256xf32, #tpu.memory_space<vmem>>, vector<1x1x256xf32>
    %271 = vector.shape_cast %270 : vector<1x1x256xf32> to vector<1x256xf32>
    %272 = vector.shape_cast %269 : vector<1x256xf32> to vector<1x1x256xf32>
    tpu.vector_store %arg4[%c0_119, %c29, %c0_120], %272 {strides = array<i32>} : memref<1x32x256xf32, #tpu.memory_space<vmem>>, vector<1x1x256xf32>,
    %c30_i32 = arith.constant 30 : i32
    %273 = arith.addi %2, %c30_i32 : i32
    %274 = arith.index_cast %273 : i32 to index
    %275 = memref.load %arg2[%274] : memref<64xi32, #tpu.memory_space<smem>>
    %c0_121 = arith.constant 0 : index
    %276 = arith.index_cast %275 : i32 to index
    %c0_122 = arith.constant 0 : index
    %277 = vector.load %arg3[%c0_121, %276, %c0_122] : memref<1x8x256xf32, #tpu.memory_space<vmem>>, vector<1x1x256xf32>
    %278 = vector.shape_cast %277 : vector<1x1x256xf32> to vector<1x256xf32>
    %c0_123 = arith.constant 0 : index
    %c30 = arith.constant 30 : index
    %c0_124 = arith.constant 0 : index
    %279 = vector.load %arg4[%c0_123, %c30, %c0_124] : memref<1x32x256xf32, #tpu.memory_space<vmem>>, vector<1x1x256xf32>
    %280 = vector.shape_cast %279 : vector<1x1x256xf32> to vector<1x256xf32>
    %281 = vector.shape_cast %278 : vector<1x256xf32> to vector<1x1x256xf32>
    tpu.vector_store %arg4[%c0_123, %c30, %c0_124], %281 {strides = array<i32>} : memref<1x32x256xf32, #tpu.memory_space<vmem>>, vector<1x1x256xf32>,
    %c31_i32 = arith.constant 31 : i32
    %282 = arith.addi %2, %c31_i32 : i32
    %283 = arith.index_cast %282 : i32 to index
    %284 = memref.load %arg2[%283] : memref<64xi32, #tpu.memory_space<smem>>
    %c0_125 = arith.constant 0 : index
    %285 = arith.index_cast %284 : i32 to index
    %c0_126 = arith.constant 0 : index
    %286 = vector.load %arg3[%c0_125, %285, %c0_126] : memref<1x8x256xf32, #tpu.memory_space<vmem>>, vector<1x1x256xf32>
    %287 = vector.shape_cast %286 : vector<1x1x256xf32> to vector<1x256xf32>
    %c0_127 = arith.constant 0 : index
    %c31 = arith.constant 31 : index
    %c0_128 = arith.constant 0 : index
    %288 = vector.load %arg4[%c0_127, %c31, %c0_128] : memref<1x32x256xf32, #tpu.memory_space<vmem>>, vector<1x1x256xf32>
    %289 = vector.shape_cast %288 : vector<1x1x256xf32> to vector<1x256xf32>
    %290 = vector.shape_cast %287 : vector<1x256xf32> to vector<1x1x256xf32>
    tpu.vector_store %arg4[%c0_127, %c31, %c0_128], %290 {strides = array<i32>} : memref<1x32x256xf32, #tpu.memory_space<vmem>>, vector<1x1x256xf32>,
    return
  }
  func.func @transform_0(%arg0: i32, %arg1: i32, %arg2: memref<64xi32, #tpu.memory_space<smem>>) -> (i32, i32, i32) {
    %c0_i32 = arith.constant 0 : i32
    %c0_i32_0 = arith.constant 0 : i32
    %c0_i32_1 = arith.constant 0 : i32
    return %arg0, %c0_i32, %c0_i32_0 : i32, i32, i32
  }
  func.func @transform_1(%arg0: i32, %arg1: i32, %arg2: memref<64xi32, #tpu.memory_space<smem>>) -> (i32, i32, i32) {
    %c0_i32 = arith.constant 0 : i32
    %c0_i32_0 = arith.constant 0 : i32
    return %arg0, %arg1, %c0_i32 : i32, i32, i32
  }
}

</mosaic_0001>

<bundles_post_ra>
// kernel: tpu_custom_call.1
= control target key start
LH: loop header
LB: loop body
LE: loop exit
PB: predicated region body
PF: predicated region fallthrough
CT: control target
= control target key end

     0   :  { %s1149_s12 = smov [#allocation3]   ;;  %s1526_s0 = inlined_call_operand.hbm [shape: s32[64], index: 0, kind: input, shape index: {}]   ;;  %s1527_s1 = inlined_call_operand.hbm [shape: f32[2,8,256], index: 1, kind: input, shape index: {}]   ;;  %s1528_s2 = inlined_call_operand.hbm [shape: f32[2,32,256], index: 2, kind: output, shape index: {}]  }
   0x1   :  { %1530 = sst [smem:[#allocation12_spill]] %s1527_s1  ;;  %s8_s11 = sshll.u32 %s1526_s0, 4  ;;  %s9_s11 = int_to_ptr.hbm [resolvable:$true] %s8_s11 }
   0x2   :  { %11 = dma.hbm_to_smem %s9_s11, 16, %s1149_s12, [#allocation2] }
   0x3   :  { %1115 = dma.done.wait [#allocation2], 16 }
   0x4   :  { %1116 = vsyncadd [#allocation2], 4294967280 }
   0x5   :  { %14 = sfence }
   0x6   :  { %15 = vsyncpa [#allocation5], 0 }
   0x7   :  { %17 = vsyncpa [#allocation5 + $0x1], 0 }
   0x8   :  { %18 = vsyncpa [#allocation6], 0 }
   0x9   :  { %20 = vsyncpa [#allocation6 + $0x1], 0  ;;  %s1170_s13 = smov 0   ;;  %s1172_s14 = smov 0  }
   0xa   :  { %s1174_s15 = smov 0   ;;  %s1176_s16 = smov 0  }
   0xb   :  { %s1178_s17 = smov 0   ;;  %s1180_s0 = smov 0  }
   0xc LB: > { %s811_s18 = sadd.s32 4294967295, %s1147_s0   ;;  %s812_s19 = sadd.s32 4294967294, %s1147_s0   ;;  %s1147_s0 = sphi %s1180_s0, %s26_s0   ;;  %s1143_s17 = sphi %s1178_s17, %s1545_s17   ;;  %s1139_s16 = sphi %s1176_s16, %s1544_s16   ;;  %s1135_s15 = sphi %s1174_s15, %s1543_s15   ;;  %s1131_s14 = sphi %s1172_s14, %s1542_s14   ;;  %s1127_s13 = sphi %s1170_s13, %s1541_s13  }
   0xd   : > { %s38_s20 = sadd.s32 1, %s1143_s17  ;;  %s45_s21 = sadd.s32 1, %s1135_s15 }
   0xe   : > { %p40_p0 = scmp.ge.s32.totalorder %s38_s20, 2  ;;  %p52_p1 = scmp.ne.s32.totalorder %s1135_s15, %s1131_s14 }
   0xf   : > { %p53_p2 = scmp.eq.s32.totalorder %s1147_s0, 0  ;;  %p58_p3 = scmp.ne.s32.totalorder %s1131_s14, %s1127_s13 }
  0x10   : > { %s1547_s20 = smov (%p40_p0, %s38_s20), 0  ;;  %p59_p5 = scmp.eq.s32.totalorder %s811_s18, 0 }
  0x11   : > { %1531 = sst [smem:[#allocation11_spill]] %s1547_s20  ;;  %p1211_p4 = por %p53_p2, %p52_p1 }
  0x12   : > { %s42_s23 = ssub.s32 %s1143_s17, %s1547_s20  ;;  %p84_p6 = scmp.eq.s32.totalorder %s811_s18, 1 }
  0x13   : > { %p43_p7 = scmp.eq.s32.totalorder %s42_s23, 0  ;;  %p1217_p8 = por %p59_p5, %p58_p3 }
  0x14   : > { %p1221_p9 = por %p84_p6, %p52_p1  ;;  %p90_p10 = scmp.eq.s32.totalorder %s812_s19, 1 }
  0x15   : > { %s1226_s26 = scalar_select %p43_p7, %s1135_s15, %s45_s21  }
  0x16   : > { %p1228_p11 = por %p90_p10, %p58_p3  ;;  %p814_p12 = scmp.ge.s32.totalorder %s1147_s0, 2 }
  0x17   : > { %p968_p13 = scmp.lt.s32.totalorder %s1147_s0, 2  ;;  %s110_s28 = sand.u32 1, %s1135_s15  }
  0x18   : > { %s815_s29 = sshll.u32 %s110_s28, 4  ;;  %s922_s30 = sshll.u32 %s1143_s17, 4 }
  0x19   : > { %s1536_s1 = sld [smem:[#allocation12_spill]]  ;;  %s114_s6 = scalar_lea.vmem [#allocation4], %s815_s29 }
  0x1a   : > { %s123_s7 = sshll.u32 %s114_s6, 4  ;;  %p961_p0 = pnand %p968_p13, %p1211_p4  ;;  %s124_s7 = int_to_ptr.vmem [resolvable:$true] %s123_s7 }
  0x1b   : > { %p818_p1 = scmp.ge.s32.totalorder %s1147_s0, 1  ;;  %p128_p2 = scmp.lt.s32.totalorder %s1147_s0, 3 }
  0x1c   : > { %s111_s9 = scalar_lea.sflag [#allocation5], %s110_s28 }
  0x1d   : > { %p129_p3 = pnand %p818_p1, %p128_p2 }
  0x1e   : > { %s1244_s10 = sand.u32 (!%p129_p3), 1, %s1131_s14  }
  0x1f   : > { %s119_s5 = scalar_lea.hbm %s1536_s1, %s922_s30  ;;  %132 = sbr.rel (%p129_p3) target bundleno = 166 (0xa6), region = 24 }
  0x20   : > { %s121_s8 = sshll.u32 %s119_s5, 4  ;;  %s819_s11 = sshll.u32 (!%p129_p3), %s1244_s10, 4  ;;  %s122_s8 = int_to_ptr.hbm [resolvable:$true] %s121_s8 }
  0x21   : > { %963 = dma.hbm_to_vmem [thread:$0]  (!%p961_p0), %s122_s8, 256, %s124_s7, %s111_s9  }
  0x22   : > { %s135_s12 = scalar_lea.sflag (!%p129_p3), [#allocation5], %s1244_s10  ;;  %s1248_s18 = scalar_lea.vmem (!%p129_p3), [#allocation4], %s819_s11 }
  0x24   : > { %1118 = dma.done.wait (%p1217_p8), %s135_s12, 256  }
  0x25   : > { %1120 = vsyncadd (%p1217_p8), %s135_s12, 4294967040  ;;  %s820_s19 = sshll.u32 %s1244_s10, 6  ;;  %s1256_s21 = sshll.u32 %s1139_s16, 5  ;;  %v172_v0 = vlaneseq }
  0x26   : > { %s162_s22 = sld [smem:[#allocation3 + %s1256_s21]]  ;;  %s178_s23 = sadd.s32 1, %s1256_s21 }
  0x27   : > { %s192_s28 = sadd.s32 2, %s1256_s21  ;;  %s179_s29 = sld [smem:[#allocation3 + %s178_s23]]  ;;  %vm1271_vm0 = vcmp.lt.s32.totalorder %v172_v0, 256 }
  0x28   : > { %s206_s30 = sadd.s32 3, %s1256_s21  ;;  %s193_s24 = sld [smem:[#allocation3 + %s192_s28]] }
  0x29   : > { %s220_s3 = sadd.s32 4, %s1256_s21  ;;  %s1263_s4 = sld [smem:[#allocation3 + %s206_s30]] }
  0x2a   : > { %s234_s5 = sadd.s32 5, %s1256_s21  ;;  %s1266_s6 = sld [smem:[#allocation3 + %s220_s3]] }
  0x2b   : > { %s1269_s12 = sld [smem:[#allocation3 + %s234_s5]]  ;;  %s1276_s20 = scalar_lea.vmem [#allocation7], %s820_s19 }
  0x2c   : > { %s163_s8 = sshra.s32 %s162_s22, 3  ;;  %s166_s9 = sand.u32 7, %s162_s22 }
  0x2d   : > { %s923_s11 = sshll.u32 %s163_s8, 4  ;;  %s180_s23 = sshra.s32 %s179_s29, 3 }
  0x2e   : > { %s169_s1 = sadd.s32 %s923_s11, %s166_s9  ;;  %s183_s30 = sand.u32 7, %s179_s29 }
  0x2f   : > { %s170_s28 = scalar_lea.vmem %s1248_s18, %s169_s1 [#allocation4]  ;;  %s924_s3 = sshll.u32 %s180_s23, 4 }
  0x30   : > { %v171_v2 = vld [vmem:[%s170_s28] ss:$8 sm:$0x3]  ;;  %s194_s7 = sshra.s32 %s193_s24, 3  ;;  %s186_s22 = sadd.s32 %s924_s3, %s183_s30 }
  0x31   : > { %176 = vst.msk [vmem:[%s1276_s20] ss:$8 sm:$0x3] %vm1271_vm0, %v171_v2  ;;  %s197_s5 = sand.u32 7, %s193_s24  ;;  %s187_s8 = scalar_lea.vmem %s1248_s18, %s186_s22 [#allocation4] }
  0x32   : > { %s925_s1 = sshll.u32 %s194_s7, 4  ;;  %v188_v3 = vld [vmem:[%s187_s8] ss:$8 sm:$0x3]  ;;  %s208_s9 = sshra.s32 %s1263_s4, 3 }
  0x33   : > { %s200_s29 = sadd.s32 %s925_s1, %s197_s5  ;;  %826 = vst.msk [vmem:[%s1276_s20 + $0x1] ss:$8 sm:$0x3] %vm1271_vm0, %v188_v3  ;;  %s211_s11 = sand.u32 7, %s1263_s4 }
  0x34   : > { %s201_s19 = scalar_lea.vmem %s1248_s18, %s200_s29 [#allocation4]  ;;  %s926_s23 = sshll.u32 %s208_s9, 4 }
  0x35   : > { %v202_v4 = vld [vmem:[%s201_s19] ss:$8 sm:$0x3]  ;;  %s222_s28 = sshra.s32 %s1266_s6, 3  ;;  %s214_s24 = sadd.s32 %s926_s23, %s211_s11 }
  0x36   : > { %829 = vst.msk [vmem:[%s1276_s20 + $0x2] ss:$8 sm:$0x3] %vm1271_vm0, %v202_v4  ;;  %s225_s7 = sand.u32 7, %s1266_s6  ;;  %s215_s30 = scalar_lea.vmem %s1248_s18, %s214_s24 [#allocation4] }
  0x37   : > { %s927_s3 = sshll.u32 %s222_s28, 4  ;;  %v216_v5 = vld [vmem:[%s215_s30] ss:$8 sm:$0x3]  ;;  %s236_s4 = sshra.s32 %s1269_s12, 3 }
  0x38   : > { %s228_s22 = sadd.s32 %s927_s3, %s225_s7  ;;  %832 = vst.msk [vmem:[%s1276_s20 + $0x3] ss:$8 sm:$0x3] %vm1271_vm0, %v216_v5  ;;  %s239_s8 = sand.u32 7, %s1269_s12 }
  0x39   : > { %s229_s5 = scalar_lea.vmem %s1248_s18, %s228_s22 [#allocation4]  ;;  %s928_s1 = sshll.u32 %s236_s4, 4 }
  0x3a   : > { %v230_v6 = vld [vmem:[%s229_s5] ss:$8 sm:$0x3]  ;;  %s1539_s29 = sadd.s32 6, %s1256_s21  ;;  %s242_s6 = sadd.s32 %s928_s1, %s239_s8 }
  0x3b   : > { %s249_s9 = sld [smem:[#allocation3 + %s1539_s29]]  ;;  %835 = vst.msk [vmem:[%s1276_s20 + $0x4] ss:$8 sm:$0x3] %vm1271_vm0, %v230_v6  ;;  %s262_s19 = sadd.s32 7, %s1256_s21 }
  0x3c   : > { %s243_s11 = scalar_lea.vmem %s1248_s18, %s242_s6 [#allocation4]  ;;  %s263_s23 = sld [smem:[#allocation3 + %s262_s19]] }
  0x3d   : > { %v244_v7 = vld [vmem:[%s243_s11] ss:$8 sm:$0x3]  ;;  %s276_s28 = sadd.s32 8, %s1256_s21  ;;  %s290_s24 = sadd.s32 9, %s1256_s21 }
  0x3e   : > { %838 = vst.msk [vmem:[%s1276_s20 + $0x5] ss:$8 sm:$0x3] %vm1271_vm0, %v244_v7  ;;  %s277_s12 = sld [smem:[#allocation3 + %s276_s28]]  ;;  %s304_s7 = sadd.s32 10, %s1256_s21 }
  0x3f   : > { %s1313_s30 = sld [smem:[#allocation3 + %s290_s24]]  ;;  %s318_s3 = sadd.s32 11, %s1256_s21 }
  0x40   : > { %s1316_s8 = sld [smem:[#allocation3 + %s304_s7]] }
  0x41   : > { %s250_s22 = sshra.s32 %s249_s9, 3  ;;  %s253_s4 = sand.u32 7, %s249_s9 }
  0x42   : > { %s929_s5 = sshll.u32 %s250_s22, 4  ;;  %s264_s29 = sshra.s32 %s263_s23, 3 }
  0x43   : > { %s256_s1 = sadd.s32 %s929_s5, %s253_s4  ;;  %s267_s19 = sand.u32 7, %s263_s23 }
  0x44   : > { %s257_s6 = scalar_lea.vmem %s1248_s18, %s256_s1 [#allocation4]  ;;  %s930_s11 = sshll.u32 %s264_s29, 4 }
  0x45   : > { %v258_v8 = vld [vmem:[%s257_s6] ss:$8 sm:$0x3]  ;;  %s278_s28 = sshra.s32 %s277_s12, 3  ;;  %s270_s9 = sadd.s32 %s930_s11, %s267_s19 }
  0x46   : > { %841 = vst.msk [vmem:[%s1276_s20 + $0x6] ss:$8 sm:$0x3] %vm1271_vm0, %v258_v8  ;;  %s281_s24 = sand.u32 7, %s277_s12  ;;  %s271_s7 = scalar_lea.vmem %s1248_s18, %s270_s9 [#allocation4] }
  0x47   : > { %s931_s22 = sshll.u32 %s278_s28, 4  ;;  %v272_v9 = vld [vmem:[%s271_s7] ss:$8 sm:$0x3]  ;;  %s292_s5 = sshra.s32 %s1313_s30, 3 }
  0x48   : > { %s284_s4 = sadd.s32 %s931_s22, %s281_s24  ;;  %844 = vst.msk [vmem:[%s1276_s20 + $0x7] ss:$8 sm:$0x3] %vm1271_vm0, %v272_v9  ;;  %s295_s1 = sand.u32 7, %s1313_s30 }
  0x49   : > { %s285_s23 = scalar_lea.vmem %s1248_s18, %s284_s4 [#allocation4]  ;;  %s932_s29 = sshll.u32 %s292_s5, 4 }
  0x4a   : > { %v286_v10 = vld [vmem:[%s285_s23] ss:$8 sm:$0x3]  ;;  %s306_s6 = sshra.s32 %s1316_s8, 3  ;;  %s298_s12 = sadd.s32 %s932_s29, %s295_s1 }
  0x4b   : > { %847 = vst.msk [vmem:[%s1276_s20 + $0x10] ss:$8 sm:$0x3] %vm1271_vm0, %v286_v10  ;;  %s309_s19 = sand.u32 7, %s1316_s8  ;;  %s299_s11 = scalar_lea.vmem %s1248_s18, %s298_s12 [#allocation4] }
  0x4c   : > { %s933_s28 = sshll.u32 %s306_s6, 4  ;;  %v300_v11 = vld [vmem:[%s299_s11] ss:$8 sm:$0x3]  ;;  %s319_s24 = sld [smem:[#allocation3 + %s318_s3]] }
  0x4d   : > { %s312_s9 = sadd.s32 %s933_s28, %s309_s19  ;;  %850 = vst.msk [vmem:[%s1276_s20 + $0x11] ss:$8 sm:$0x3] %vm1271_vm0, %v300_v11  ;;  %s332_s7 = sadd.s32 12, %s1256_s21 }
  0x4e   : > { %s313_s30 = scalar_lea.vmem %s1248_s18, %s312_s9 [#allocation4]  ;;  %s333_s22 = sld [smem:[#allocation3 + %s332_s7]] }
  0x4f   : > { %v314_v12 = vld [vmem:[%s313_s30] ss:$8 sm:$0x3]  ;;  %s346_s4 = sadd.s32 13, %s1256_s21  ;;  %s360_s5 = sadd.s32 14, %s1256_s21 }
  0x50   : > { %853 = vst.msk [vmem:[%s1276_s20 + $0x12] ss:$8 sm:$0x3] %vm1271_vm0, %v314_v12  ;;  %s347_s8 = sld [smem:[#allocation3 + %s346_s4]]  ;;  %s374_s1 = sadd.s32 15, %s1256_s21 }
  0x51   : > { %s1347_s23 = sld [smem:[#allocation3 + %s360_s5]]  ;;  %s388_s3 = sadd.s32 16, %s1256_s21 }
  0x52   : > { %s1350_s29 = sld [smem:[#allocation3 + %s374_s1]]  ;;  %s320_s6 = sshra.s32 %s319_s24, 3 }
  0x53   : > { %s323_s12 = sand.u32 7, %s319_s24  ;;  %s934_s19 = sshll.u32 %s320_s6, 4 }
  0x54   : > { %s1353_s11 = sld [smem:[#allocation3 + %s388_s3]]  ;;  %s326_s28 = sadd.s32 %s934_s19, %s323_s12 }
  0x55   : > { %s334_s9 = sshra.s32 %s333_s22, 3  ;;  %s327_s30 = scalar_lea.vmem %s1248_s18, %s326_s28 [#allocation4] }
  0x56   : > { %s337_s7 = sand.u32 7, %s333_s22  ;;  %v328_v13 = vld [vmem:[%s327_s30] ss:$8 sm:$0x3]  ;;  %s935_s4 = sshll.u32 %s334_s9, 4 }
  0x57   : > { %s348_s5 = sshra.s32 %s347_s8, 3  ;;  %856 = vst.msk [vmem:[%s1276_s20 + $0x13] ss:$8 sm:$0x3] %vm1271_vm0, %v328_v13  ;;  %s340_s24 = sadd.s32 %s935_s4, %s337_s7 }
  0x58   : > { %s351_s1 = sand.u32 7, %s347_s8  ;;  %s341_s3 = scalar_lea.vmem %s1248_s18, %s340_s24 [#allocation4] }
  0x59   : > { %s936_s6 = sshll.u32 %s348_s5, 4  ;;  %v342_v14 = vld [vmem:[%s341_s3] ss:$8 sm:$0x3]  ;;  %s362_s19 = sshra.s32 %s1347_s23, 3 }
  0x5a   : > { %s354_s12 = sadd.s32 %s936_s6, %s351_s1  ;;  %859 = vst.msk [vmem:[%s1276_s20 + $0x14] ss:$8 sm:$0x3] %vm1271_vm0, %v342_v14  ;;  %s365_s28 = sand.u32 7, %s1347_s23 }
  0x5b   : > { %s355_s22 = scalar_lea.vmem %s1248_s18, %s354_s12 [#allocation4]  ;;  %s937_s9 = sshll.u32 %s362_s19, 4 }
  0x5c   : > { %v356_v15 = vld [vmem:[%s355_s22] ss:$8 sm:$0x3]  ;;  %s376_s30 = sshra.s32 %s1350_s29, 3  ;;  %s368_s8 = sadd.s32 %s937_s9, %s365_s28 }
  0x5d   : > { %862 = vst.msk [vmem:[%s1276_s20 + $0x15] ss:$8 sm:$0x3] %vm1271_vm0, %v356_v15  ;;  %s379_s7 = sand.u32 7, %s1350_s29  ;;  %s369_s4 = scalar_lea.vmem %s1248_s18, %s368_s8 [#allocation4] }
  0x5e   : > { %s938_s5 = sshll.u32 %s376_s30, 4  ;;  %v370_v16 = vld [vmem:[%s369_s4] ss:$8 sm:$0x3]  ;;  %s390_s1 = sshra.s32 %s1353_s11, 3 }
  0x5f   : > { %s382_s24 = sadd.s32 %s938_s5, %s379_s7  ;;  %865 = vst.msk [vmem:[%s1276_s20 + $0x16] ss:$8 sm:$0x3] %vm1271_vm0, %v370_v16  ;;  %s393_s3 = sand.u32 7, %s1353_s11 }
  0x60   : > { %s383_s23 = scalar_lea.vmem %s1248_s18, %s382_s24 [#allocation4]  ;;  %s939_s6 = sshll.u32 %s390_s1, 4 }
  0x61   : > { %v384_v17 = vld [vmem:[%s383_s23] ss:$8 sm:$0x3]  ;;  %s402_s12 = sadd.s32 17, %s1256_s21  ;;  %s396_s29 = sadd.s32 %s939_s6, %s393_s3 }
  0x62   : > { %868 = vst.msk [vmem:[%s1276_s20 + $0x17] ss:$8 sm:$0x3] %vm1271_vm0, %v384_v17  ;;  %s403_s19 = sld [smem:[#allocation3 + %s402_s12]]  ;;  %s397_s22 = scalar_lea.vmem %s1248_s18, %s396_s29 [#allocation4] }
  0x63   : > { %s416_s28 = sadd.s32 18, %s1256_s21  ;;  %v398_v18 = vld [vmem:[%s397_s22] ss:$8 sm:$0x3]  ;;  %s430_s30 = sadd.s32 19, %s1256_s21 }
  0x64   : > { %s417_s9 = sld [smem:[#allocation3 + %s416_s28]]  ;;  %871 = vst.msk [vmem:[%s1276_s20 + $0x20] ss:$8 sm:$0x3] %vm1271_vm0, %v398_v18  ;;  %s444_s8 = sadd.s32 20, %s1256_s21 }
  0x65   : > { %s431_s11 = sld [smem:[#allocation3 + %s430_s30]]  ;;  %s458_s4 = sadd.s32 21, %s1256_s21 }
  0x66   : > { %s1389_s7 = sld [smem:[#allocation3 + %s444_s8]]  ;;  %s472_s24 = sadd.s32 22, %s1256_s21 }
  0x67   : > { %s1392_s5 = sld [smem:[#allocation3 + %s458_s4]] }
  0x68   : > { %s404_s1 = sshra.s32 %s403_s19, 3  ;;  %s407_s23 = sand.u32 7, %s403_s19 }
  0x69   : > { %s940_s3 = sshll.u32 %s404_s1, 4  ;;  %s1395_s6 = sld [smem:[#allocation3 + %s472_s24]] }
  0x6a   : > { %s410_s12 = sadd.s32 %s940_s3, %s407_s23  ;;  %s418_s29 = sshra.s32 %s417_s9, 3 }
  0x6b   : > { %s411_s22 = scalar_lea.vmem %s1248_s18, %s410_s12 [#allocation4]  ;;  %s421_s28 = sand.u32 7, %s417_s9 }
  0x6c   : > { %v412_v19 = vld [vmem:[%s411_s22] ss:$8 sm:$0x3]  ;;  %s941_s30 = sshll.u32 %s418_s29, 4  ;;  %s432_s8 = sshra.s32 %s431_s11, 3 }
  0x6d   : > { %874 = vst.msk [vmem:[%s1276_s20 + $0x21] ss:$8 sm:$0x3] %vm1271_vm0, %v412_v19  ;;  %s424_s19 = sadd.s32 %s941_s30, %s421_s28  ;;  %s435_s4 = sand.u32 7, %s431_s11 }
  0x6e   : > { %s425_s24 = scalar_lea.vmem %s1248_s18, %s424_s19 [#allocation4]  ;;  %s942_s1 = sshll.u32 %s432_s8, 4 }
  0x6f   : > { %v426_v20 = vld [vmem:[%s425_s24] ss:$8 sm:$0x3]  ;;  %s438_s23 = sadd.s32 %s942_s1, %s435_s4  ;;  %s446_s3 = sshra.s32 %s1389_s7, 3 }
  0x70   : > { %877 = vst.msk [vmem:[%s1276_s20 + $0x22] ss:$8 sm:$0x3] %vm1271_vm0, %v426_v20  ;;  %s439_s9 = scalar_lea.vmem %s1248_s18, %s438_s23 [#allocation4]  ;;  %s449_s12 = sand.u32 7, %s1389_s7 }
  0x71   : > { %v440_v21 = vld [vmem:[%s439_s9] ss:$8 sm:$0x3]  ;;  %s943_s29 = sshll.u32 %s446_s3, 4  ;;  %s460_s22 = sshra.s32 %s1392_s5, 3 }
  0x72   : > { %880 = vst.msk [vmem:[%s1276_s20 + $0x23] ss:$8 sm:$0x3] %vm1271_vm0, %v440_v21  ;;  %s452_s11 = sadd.s32 %s943_s29, %s449_s12  ;;  %s463_s28 = sand.u32 7, %s1392_s5 }
  0x73   : > { %s453_s30 = scalar_lea.vmem %s1248_s18, %s452_s11 [#allocation4]  ;;  %s944_s8 = sshll.u32 %s460_s22, 4 }
  0x74   : > { %v454_v22 = vld [vmem:[%s453_s30] ss:$8 sm:$0x3]  ;;  %s466_s19 = sadd.s32 %s944_s8, %s463_s28  ;;  %s474_s4 = sshra.s32 %s1395_s6, 3 }
  0x75   : > { %883 = vst.msk [vmem:[%s1276_s20 + $0x24] ss:$8 sm:$0x3] %vm1271_vm0, %v454_v22  ;;  %s467_s7 = scalar_lea.vmem %s1248_s18, %s466_s19 [#allocation4]  ;;  %s477_s24 = sand.u32 7, %s1395_s6 }
  0x76   : > { %v468_v23 = vld [vmem:[%s467_s7] ss:$8 sm:$0x3]  ;;  %s945_s1 = sshll.u32 %s474_s4, 4  ;;  %s486_s23 = sadd.s32 23, %s1256_s21 }
  0x77   : > { %886 = vst.msk [vmem:[%s1276_s20 + $0x25] ss:$8 sm:$0x3] %vm1271_vm0, %v468_v23  ;;  %s480_s5 = sadd.s32 %s945_s1, %s477_s24  ;;  %s487_s3 = sld [smem:[#allocation3 + %s486_s23]] }
  0x78   : > { %s481_s9 = scalar_lea.vmem %s1248_s18, %s480_s5 [#allocation4]  ;;  %s500_s12 = sadd.s32 24, %s1256_s21 }
  0x79   : > { %v482_v24 = vld [vmem:[%s481_s9] ss:$8 sm:$0x3]  ;;  %s501_s29 = sld [smem:[#allocation3 + %s500_s12]]  ;;  %s514_s22 = sadd.s32 25, %s1256_s21 }
  0x7a   : > { %889 = vst.msk [vmem:[%s1276_s20 + $0x26] ss:$8 sm:$0x3] %vm1271_vm0, %v482_v24  ;;  %s515_s6 = sld [smem:[#allocation3 + %s514_s22]]  ;;  %s528_s11 = sadd.s32 26, %s1256_s21 }
  0x7b   : > { %s1431_s28 = sld [smem:[#allocation3 + %s528_s11]]  ;;  %s542_s30 = sadd.s32 27, %s1256_s21 }
  0x7c   : > { %s1434_s8 = sld [smem:[#allocation3 + %s542_s30]]  ;;  %s556_s19 = sadd.s32 28, %s1256_s21 }
  0x7d   : > { %s488_s4 = sshra.s32 %s487_s3, 3  ;;  %s491_s7 = sand.u32 7, %s487_s3 }
  0x7e   : > { %s946_s24 = sshll.u32 %s488_s4, 4  ;;  %s1437_s1 = sld [smem:[#allocation3 + %s556_s19]] }
  0x7f   : > { %s494_s23 = sadd.s32 %s946_s24, %s491_s7  ;;  %s502_s5 = sshra.s32 %s501_s29, 3 }
  0x80   : > { %s495_s9 = scalar_lea.vmem %s1248_s18, %s494_s23 [#allocation4]  ;;  %s505_s12 = sand.u32 7, %s501_s29 }
  0x81   : > { %v496_v25 = vld [vmem:[%s495_s9] ss:$8 sm:$0x3]  ;;  %s947_s22 = sshll.u32 %s502_s5, 4  ;;  %s516_s11 = sshra.s32 %s515_s6, 3 }
  0x82   : > { %892 = vst.msk [vmem:[%s1276_s20 + $0x27] ss:$8 sm:$0x3] %vm1271_vm0, %v496_v25  ;;  %s508_s3 = sadd.s32 %s947_s22, %s505_s12  ;;  %s519_s30 = sand.u32 7, %s515_s6 }
  0x83   : > { %s509_s19 = scalar_lea.vmem %s1248_s18, %s508_s3 [#allocation4]  ;;  %s948_s4 = sshll.u32 %s516_s11, 4 }
  0x84   : > { %v510_v26 = vld [vmem:[%s509_s19] ss:$8 sm:$0x3]  ;;  %s522_s7 = sadd.s32 %s948_s4, %s519_s30  ;;  %s530_s24 = sshra.s32 %s1431_s28, 3 }
  0x85   : > { %895 = vst.msk [vmem:[%s1276_s20 + $0x30] ss:$8 sm:$0x3] %vm1271_vm0, %v510_v26  ;;  %s523_s29 = scalar_lea.vmem %s1248_s18, %s522_s7 [#allocation4]  ;;  %s533_s23 = sand.u32 7, %s1431_s28 }
  0x86   : > { %v524_v27 = vld [vmem:[%s523_s29] ss:$8 sm:$0x3]  ;;  %s949_s5 = sshll.u32 %s530_s24, 4  ;;  %s544_s9 = sshra.s32 %s1434_s8, 3 }
  0x87   : > { %898 = vst.msk [vmem:[%s1276_s20 + $0x31] ss:$8 sm:$0x3] %vm1271_vm0, %v524_v27  ;;  %s536_s6 = sadd.s32 %s949_s5, %s533_s23  ;;  %s547_s12 = sand.u32 7, %s1434_s8 }
  0x88   : > { %s537_s22 = scalar_lea.vmem %s1248_s18, %s536_s6 [#allocation4]  ;;  %s950_s11 = sshll.u32 %s544_s9, 4 }
  0x89   : > { %v538_v28 = vld [vmem:[%s537_s22] ss:$8 sm:$0x3]  ;;  %s550_s3 = sadd.s32 %s950_s11, %s547_s12  ;;  %s558_s30 = sshra.s32 %s1437_s1, 3 }
  0x8a   : > { %901 = vst.msk [vmem:[%s1276_s20 + $0x32] ss:$8 sm:$0x3] %vm1271_vm0, %v538_v28  ;;  %s551_s28 = scalar_lea.vmem %s1248_s18, %s550_s3 [#allocation4]  ;;  %s561_s19 = sand.u32 7, %s1437_s1 }
  0x8b   : > { %v552_v29 = vld [vmem:[%s551_s28] ss:$8 sm:$0x3]  ;;  %s951_s4 = sshll.u32 %s558_s30, 4  ;;  %s570_s7 = sadd.s32 29, %s1256_s21 }
  0x8c   : > { %904 = vst.msk [vmem:[%s1276_s20 + $0x33] ss:$8 sm:$0x3] %vm1271_vm0, %v552_v29  ;;  %s564_s8 = sadd.s32 %s951_s4, %s561_s19  ;;  %s571_s24 = sld [smem:[#allocation3 + %s570_s7]] }
  0x8d   : > { %s565_s29 = scalar_lea.vmem %s1248_s18, %s564_s8 [#allocation4]  ;;  %s584_s23 = sadd.s32 30, %s1256_s21 }
  0x8e   : > { %v566_v30 = vld [vmem:[%s565_s29] ss:$8 sm:$0x3]  ;;  %s585_s5 = sld [smem:[#allocation3 + %s584_s23]]  ;;  %s598_s9 = sadd.s32 31, %s1256_s21 }
  0x8f   : > { %907 = vst.msk [vmem:[%s1276_s20 + $0x34] ss:$8 sm:$0x3] %vm1271_vm0, %v566_v30  ;;  %s599_s6 = sld [smem:[#allocation3 + %s598_s9]]  ;;  %s955_s1 = sshll.u32 %s1139_s16, 6 }
  0x90   : > { %s628_s12 = sshll.u32 %s1276_s20, 4  ;;  %s627_s3 = scalar_lea.hbm %s1528_s2, %s955_s1  ;;  %s1477_s12 = int_to_ptr.vmem [resolvable:$true] %s628_s12 }
  0x91   : > { %s630_s4 = sshll.u32 %s627_s3, 4  ;;  %s631_s4 = int_to_ptr.hbm [resolvable:$true] %s630_s4 }
  0x92   : > { %s572_s30 = sshra.s32 %s571_s24, 3  ;;  %s575_s28 = sand.u32 7, %s571_s24 }
  0x93   : > { %s952_s19 = sshll.u32 %s572_s30, 4  ;;  %s1077_s30 = sshra.s32 %s631_s4, 4  ;;  %s1078_s30 = int_to_ptr.hbm [resolvable:$true] %s1077_s30 }
  0x94   : > { %s578_s21 = sadd.s32 %s952_s19, %s575_s28  ;;  %s586_s7 = sshra.s32 %s585_s5, 3 }
  0x95   : > { %s579_s8 = scalar_lea.vmem %s1248_s18, %s578_s21 [#allocation4]  ;;  %s589_s29 = sand.u32 7, %s585_s5 }
  0x96   : > { %v580_v31 = vld [vmem:[%s579_s8] ss:$8 sm:$0x3]  ;;  %s953_s16 = sshll.u32 %s586_s7, 4  ;;  %s600_s23 = sshra.s32 %s599_s6, 3 }
  0x97   : > { %910 = vst.msk [vmem:[%s1276_s20 + $0x35] ss:$8 sm:$0x3] %vm1271_vm0, %v580_v31  ;;  %s592_s9 = sadd.s32 %s953_s16, %s589_s29  ;;  %s603_s1 = sand.u32 7, %s599_s6 }
  0x98   : > { %s593_s24 = scalar_lea.vmem %s1248_s18, %s592_s9 [#allocation4]  ;;  %s954_s22 = sshll.u32 %s600_s23, 4 }
  0x99   : > { %v594_v32 = vld [vmem:[%s593_s24] ss:$8 sm:$0x3]  ;;  %s606_s11 = sadd.s32 %s954_s22, %s603_s1  ;;  %s613_s5 = scalar_lea.sflag [#allocation6], %s1244_s10 }
  0x9a   : > { %913 = vst.msk [vmem:[%s1276_s20 + $0x36] ss:$8 sm:$0x3] %vm1271_vm0, %v594_v32  ;;  %s607_s3 = scalar_lea.vmem %s1248_s18, %s606_s11 [#allocation4]  ;;  %s1079_s28 = scalar_lea.hbm %s1078_s30, 64 }
  0x9b   : > { %v608_v33 = vld [vmem:[%s607_s3] ss:$8 sm:$0x3]  ;;  %p1080_p4 = scmp.ne.s32.totalorder %s1078_s30, %s1079_s28  ;;  %s1083_s21 = scalar_lea.hbm %s1528_s2, 128 }
  0x9c   : > { %916 = vst.msk [vmem:[%s1276_s20 + $0x37] ss:$8 sm:$0x3] %vm1271_vm0, %v608_v33  ;;  %p1084_p7 = scmp.lt.s32.totalorder %s1078_s30, %s1528_s2  ;;  %p1085_p8 = scmp.lt.s32.totalorder %s1083_s21, %s1079_s28 }
  0x9d   : > { %p1081_p5 = pnand %p1080_p4, %p1221_p9 }
  0x9e   : > { %p1086_p10 = por %p1085_p8, %p1084_p7 }
  0x9f   : > { %p1082_p6 = pneg %p1081_p5 }
  0xa1   : > { %p1087_p13 = pnand %p1086_p10, %p1082_p6 }
  0xa3   : > { %1090 = shalt.err (!%p1087_p13)
}
  0xa4   : > { %s1150_s20 = smov 256   ;;  %s1151_s10 = smov 16  }
  0xa5   : > { %958 = dma.vmem_to_hbm [thread:$0]  (%p1221_p9), %s1477_s12, 1024, %s631_s4, %s613_s5, %s1150_s20, %s1150_s20, %s1151_s10  }
  0xa6 PF: > { %s645_s18 = sand.u32 1, %s1127_s13   ;;  %p965_p0 = pnand %p814_p12, %p1228_p11 }
  0xa7   : > { %s646_s29 = scalar_lea.sflag [#allocation6], %s645_s18 }
  0xa8   : > { %p966_p1 = pneg %p965_p0 }
  0xaa   : > { %1122 = dma.done.wait (%p966_p1), %s646_s29, 1024  }
  0xab   : > { %1124 = vsyncadd (%p966_p1), %s646_s29, 4294966272  ;;  %s26_s0 = sadd.s32 1, %s1147_s0   ;;  %s1540_s25 = sld [smem:[#allocation11_spill]] }
  0xac   : > { %p23_p2 = scmp.ge.s32.totalorder %s26_s0, 4   ;;  %s1541_s13 = smov %s1131_s14 }
  0xad   : > { %s1542_s14 = smov %s1135_s15  ;;  %s1543_s15 = smov %s1226_s26 }
  0xae   : > { %s1544_s16 = smov %s1143_s17  ;;  %25 = sbr.rel (!%p23_p2) target bundleno = 12 (0xc), region = 132 }
  0xb1   : > { %s1545_s17 = smov %s1540_s25 }
  0xb3   :  { %652 = vsyncpa [#allocation5], 1 }
  0xb4   :  { %654 = vsyncpa [#allocation5 + $0x1], 1 }
  0xb5   :  { %655 = vsyncpa [#allocation6], 1 }
  0xb6   :  { %657 = vsyncpa [#allocation6 + $0x1], 1 }

</bundles_post_ra>
